<compile_context>
chip_gen: v6e
topology: v6e:2x2x1
jax: 0.10.0
libtpu: 0.0.40
codegen_flags: <defaults>
</compile_context>

<pallas_src>
import functools

import jax
import jax.numpy as jnp
from jax.experimental import pallas as pl
from jax.experimental.pallas import tpu as pltpu


def _round_up(x, m):
    return ((x + m - 1) // m) * m


def _conv_bn_act_kernel(x_ref, w_ref, shift_ref, o_ref, acc_ref, *, apply_act):
    # x_ref:     (1, TK, TM)  activation tile, spatial on the lane axis
    # w_ref:     (Cout, TK)   BN-scale-folded 1x1 conv weight (bf16)
    # shift_ref: (Cout, 1)    folded BN shift = beta - mean * scale (f32)
    # o_ref:     (1, Cout, TM)
    # acc_ref:   (Cout, TM)   f32 accumulator over the K (Cin) grid axis
    k = pl.program_id(2)

    @pl.when(k == 0)
    def _():
        acc_ref[...] = jnp.zeros_like(acc_ref)

    x_bf16 = x_ref[0].astype(jnp.bfloat16)          # cast on VPU, feed MXU bf16
    acc_ref[...] += jnp.dot(w_ref[...], x_bf16,
                            preferred_element_type=jnp.float32)

    @pl.when(k == pl.num_programs(2) - 1)
    def _():
        y = acc_ref[...] + shift_ref[...]
        if apply_act:
            y = jnp.maximum(y, 0.0)
        o_ref[0] = y.astype(o_ref.dtype)


@functools.partial(jax.jit, static_argnames=("apply_act",))
def conv_bn_act(x_nchw, weight, gamma, beta, running_mean, running_var,
                eps=1e-5, apply_act=True):
    """ConvBnAct forward (kernel_size=1, stride=1, groups=1, bias=False).

    x_nchw : (N, Cin, H, W) float32
    weight : (Cout, Cin, 1, 1) conv weight (PyTorch layout)
    gamma/beta/running_mean/running_var : (Cout,)
    Returns (N, Cout, H, W) float32.
    """
    n, cin, h, w = x_nchw.shape
    cout = weight.shape[0]
    hw = h * w

    # --- glue: fold BN into weight/shift (one-time, O(Cin*Cout)) ----------
    scale = gamma.astype(jnp.float32) / jnp.sqrt(
        running_var.astype(jnp.float32) + eps)                   # (Cout,)
    shift = (beta.astype(jnp.float32)
             - running_mean.astype(jnp.float32) * scale)          # (Cout,)
    w_mat = weight.reshape(cout, cin).astype(jnp.float32)
    w_folded = (w_mat * scale[:, None]).astype(jnp.bfloat16)      # (Cout, Cin)
    shift2 = shift.reshape(cout, 1)

    # --- flatten spatial, keep NCHW (free reshape, no transpose) ----------
    x_flat = x_nchw.reshape(n, cin, hw)

    # Spatial (lane) tile: large, multiple of 128; pad spatial if needed.
    tm = min(512, _round_up(hw, 128))
    hwp = _round_up(hw, tm)
    if hwp != hw:
        x_flat = jnp.pad(x_flat, ((0, 0), (0, 0), (0, hwp - hw)))

    # Contraction (Cin) tile: only split when Cin is large, to bound VMEM.
    if cin >= 1024 and cin % 512 == 0:
        tk = 512
    else:
        tk = cin
    nk = cin // tk

    grid = (n, hwp // tm, nk)   # reduction axis last

    flops = 2 * n * hwp * cin * cout
    bytes_accessed = (x_flat.size * x_flat.dtype.itemsize
                      + w_folded.size * 2 + shift2.size * 4
                      + n * cout * hwp * 4)

    out = pl.pallas_call(
        functools.partial(_conv_bn_act_kernel, apply_act=apply_act),
        out_shape=jax.ShapeDtypeStruct((n, cout, hwp), jnp.float32),
        grid_spec=pltpu.PrefetchScalarGridSpec(
            num_scalar_prefetch=0,
            grid=grid,
            in_specs=[
                pl.BlockSpec((1, tk, tm), lambda b, j, k: (b, k, j)),
                pl.BlockSpec((cout, tk), lambda b, j, k: (0, k)),
                pl.BlockSpec((cout, 1), lambda b, j, k: (0, 0)),
            ],
            out_specs=pl.BlockSpec((1, cout, tm), lambda b, j, k: (b, 0, j)),
            scratch_shapes=[pltpu.VMEM((cout, tm), jnp.float32)],
        ),
        compiler_params=pltpu.CompilerParams(
            dimension_semantics=("parallel", "parallel", "arbitrary"),
            vmem_limit_bytes=48 * 1024 * 1024,
        ),
        cost_estimate=pl.CostEstimate(
            flops=flops, transcendentals=0, bytes_accessed=bytes_accessed),
    )(x_flat, w_folded, shift2)

    if hwp != hw:
        out = out[:, :, :hw]
    return out.reshape(n, cout, h, w)


if __name__ == "__main__":
    key = jax.random.PRNGKey(0)
    k1, k2, k3, k4, k5, k6 = jax.random.split(key, 6)

    # Small shapes: batch=2, in_channels=4, out_channels=8, spatial=16x16
    N, CIN, COUT, H, W = 2, 4, 8, 16, 16

    x = jax.random.normal(k1, (N, CIN, H, W), dtype=jnp.float32)
    conv_w = jax.random.normal(k2, (COUT, CIN, 1, 1), dtype=jnp.float32) * 0.1
    gamma = 1.0 + 0.1 * jax.random.normal(k3, (COUT,), dtype=jnp.float32)
    beta = 0.1 * jax.random.normal(k4, (COUT,), dtype=jnp.float32)
    running_mean = 0.1 * jax.random.normal(k5, (COUT,), dtype=jnp.float32)
    running_var = jnp.abs(
        1.0 + 0.1 * jax.random.normal(k6, (COUT,), dtype=jnp.float32))

    out = conv_bn_act(x, conv_w, gamma, beta, running_mean, running_var)
    out = jax.block_until_ready(out)
    assert out.shape == (N, COUT, H, W)

    # Reference 1: same bf16-rounded operands as the kernel, f32 math (tight).
    scale = gamma / jnp.sqrt(running_var + 1e-5)
    shift = beta - running_mean * scale
    w_folded_ref = ((conv_w.reshape(COUT, CIN) * scale[:, None])
                    .astype(jnp.bfloat16).astype(jnp.float32))
    x_bf = x.astype(jnp.bfloat16).astype(jnp.float32)
    ref = jnp.einsum("nchw,oc->nohw", x_bf, w_folded_ref)
    ref = ref + shift[None, :, None, None]
    ref = jnp.maximum(ref, 0.0)
    assert jnp.allclose(out, ref, atol=2e-3, rtol=2e-3), "bf16-consistent check"

    # Reference 2: pure f32 module semantics (loose, accounts for bf16 inputs).
    ref32 = jnp.einsum("nchw,oc->nohw", x, conv_w.reshape(COUT, CIN))
    ref32 = ref32 * scale[None, :, None, None] + shift[None, :, None, None]
    ref32 = jnp.maximum(ref32, 0.0)
    assert jnp.allclose(out, ref32, atol=5e-2, rtol=5e-2), "f32 semantics check"

    print("KERNEL_OK")
</pallas_src>

<mosaic_0001>
module attributes {stable_mosaic.version = 11 : i64} {
  func.func @_conv_bn_act_kernel(%arg0: i32, %arg1: i32, %arg2: i32, %arg3: memref<1x4x256xf32, #tpu.memory_space<vmem>>, %arg4: memref<8x4xbf16, #tpu.memory_space<vmem>>, %arg5: memref<8x1xf32, #tpu.memory_space<vmem>>, %arg6: memref<1x8x256xf32, #tpu.memory_space<vmem>>, %arg7: memref<8x256xf32, #tpu.memory_space<vmem>>) attributes {dimension_semantics = [#tpu.dimension_semantics<parallel>, #tpu.dimension_semantics<parallel>, #tpu.dimension_semantics<arbitrary>], iteration_bounds = array<i64: 2, 1, 1>, scalar_prefetch = 0 : i64, scratch_operands = 1 : i64, tpu.core_type = #tpu.core_type<tc>, window_params = [{transform_indices = @transform_0, window_bounds = array<i64: 1, 4, 256>}, {transform_indices = @transform_1, window_bounds = array<i64: 8, 4>}, {pipeline_mode = #tpu.pipeline_mode<synchronous>, transform_indices = @transform_2, window_bounds = array<i64: 8, 1>}, {transform_indices = @transform_3, window_bounds = array<i64: 1, 8, 256>}]} {
    %c0_i32 = arith.constant 0 : i32
    %0 = arith.cmpi eq, %arg2, %c0_i32 : i32
    %1 = arith.extui %0 : i1 to i32
    %c0_i32_0 = arith.constant 0 : i32
    %2 = arith.cmpi ne, %1, %c0_i32_0 : i32
    scf.if %2 {
      %cst_11 = arith.constant 0.000000e+00 : f32
      %14 = vector.broadcast %cst_11 : f32 to vector<8x256xf32>
      %c0_12 = arith.constant 0 : index
      %c0_13 = arith.constant 0 : index
      %15 = vector.load %arg7[%c0_12, %c0_13] : memref<8x256xf32, #tpu.memory_space<vmem>>, vector<8x256xf32>
      tpu.vector_store %arg7[%c0_12, %c0_13], %14 {strides = array<i32>} : memref<8x256xf32, #tpu.memory_space<vmem>>, vector<8x256xf32>,
    } else {
    }
    %c0 = arith.constant 0 : index
    %c0_1 = arith.constant 0 : index
    %c0_2 = arith.constant 0 : index
    %3 = vector.load %arg3[%c0, %c0_1, %c0_2] : memref<1x4x256xf32, #tpu.memory_space<vmem>>, vector<1x4x256xf32>
    %4 = vector.shape_cast %3 : vector<1x4x256xf32> to vector<4x256xf32>
    %5 = arith.truncf %4 : vector<4x256xf32> to vector<4x256xbf16>
    %c0_3 = arith.constant 0 : index
    %c0_4 = arith.constant 0 : index
    %6 = vector.load %arg7[%c0_3, %c0_4] : memref<8x256xf32, #tpu.memory_space<vmem>>, vector<8x256xf32>
    %c0_5 = arith.constant 0 : index
    %c0_6 = arith.constant 0 : index
    %7 = vector.load %arg4[%c0_5, %c0_6] : memref<8x4xbf16, #tpu.memory_space<vmem>>, vector<8x4xbf16>
    %cst = arith.constant dense<0.000000e+00> : vector<8x256xf32>
    %8 = tpu.matmul %7, %5, %cst {dimension_numbers = #tpu.dot_dimension_numbers<[1], [0], [0], [1], [0, 0, 1, 1], [], []>} : vector<8x4xbf16>, vector<4x256xbf16>, vector<8x256xf32> -> vector<8x256xf32>
    %9 = arith.addf %6, %8 : vector<8x256xf32>
    %c0_7 = arith.constant 0 : index
    %c0_8 = arith.constant 0 : index
    %10 = vector.load %arg7[%c0_7, %c0_8] : memref<8x256xf32, #tpu.memory_space<vmem>>, vector<8x256xf32>
    tpu.vector_store %arg7[%c0_7, %c0_8], %9 {strides = array<i32>} : memref<8x256xf32, #tpu.memory_space<vmem>>, vector<8x256xf32>,
    %c0_i32_9 = arith.constant 0 : i32
    %11 = arith.cmpi eq, %arg2, %c0_i32_9 : i32
    %12 = arith.extui %11 : i1 to i32
    %c0_i32_10 = arith.constant 0 : i32
    %13 = arith.cmpi ne, %12, %c0_i32_10 : i32
    scf.if %13 {
      %c0_11 = arith.constant 0 : index
      %c0_12 = arith.constant 0 : index
      %14 = vector.load %arg7[%c0_11, %c0_12] : memref<8x256xf32, #tpu.memory_space<vmem>>, vector<8x256xf32>
      %c0_13 = arith.constant 0 : index
      %c0_14 = arith.constant 0 : index
      %15 = vector.load %arg5[%c0_13, %c0_14] : memref<8x1xf32, #tpu.memory_space<vmem>>, vector<8x1xf32>
      %16 = vector.broadcast %15 : vector<8x1xf32> to vector<8x256xf32>
      %17 = arith.addf %14, %16 : vector<8x256xf32>
      %cst_15 = arith.constant 0.000000e+00 : f32
      %18 = vector.broadcast %cst_15 : f32 to vector<8x256xf32>
      %19 = arith.maximumf %17, %18 : vector<8x256xf32>
      %c0_16 = arith.constant 0 : index
      %c0_17 = arith.constant 0 : index
      %c0_18 = arith.constant 0 : index
      %20 = vector.load %arg6[%c0_16, %c0_17, %c0_18] : memref<1x8x256xf32, #tpu.memory_space<vmem>>, vector<1x8x256xf32>
      %21 = vector.shape_cast %20 : vector<1x8x256xf32> to vector<8x256xf32>
      %22 = vector.shape_cast %19 : vector<8x256xf32> to vector<1x8x256xf32>
      tpu.vector_store %arg6[%c0_16, %c0_17, %c0_18], %22 {strides = array<i32>} : memref<1x8x256xf32, #tpu.memory_space<vmem>>, vector<1x8x256xf32>,
    } else {
    }
    return
  }
  func.func @transform_0(%arg0: i32, %arg1: i32, %arg2: i32) -> (i32, i32, i32) {
    %c0_i32 = arith.constant 0 : i32
    return %arg0, %arg2, %arg1 : i32, i32, i32
  }
  func.func @transform_1(%arg0: i32, %arg1: i32, %arg2: i32) -> (i32, i32) {
    %c0_i32 = arith.constant 0 : i32
    %c0_i32_0 = arith.constant 0 : i32
    return %c0_i32, %arg2 : i32, i32
  }
  func.func @transform_2(%arg0: i32, %arg1: i32, %arg2: i32) -> (i32, i32) {
    %c0_i32 = arith.constant 0 : i32
    %c0_i32_0 = arith.constant 0 : i32
    %c0_i32_1 = arith.constant 0 : i32
    return %c0_i32, %c0_i32_0 : i32, i32
  }
  func.func @transform_3(%arg0: i32, %arg1: i32, %arg2: i32) -> (i32, i32, i32) {
    %c0_i32 = arith.constant 0 : i32
    %c0_i32_0 = arith.constant 0 : i32
    return %arg0, %c0_i32, %arg1 : i32, i32, i32
  }
}

</mosaic_0001>

<bundles_post_ra>
// kernel: conv_bn_act.1
= control target key start
LH: loop header
LB: loop body
LE: loop exit
PB: predicated region body
PF: predicated region fallthrough
CT: control target
= control target key end

     0   :  { %s536_s12 = smov 0   ;;  %s538_s13 = smov 0   ;;  %s575_s0 = inlined_call_operand.vmem [shape: f32[2,4,256], index: 0, kind: input, shape index: {}]   ;;  %s576_s1 = inlined_call_operand.vmem [shape: bf16[8,4], index: 1, kind: input, shape index: {}]   ;;  %s577_s2 = inlined_call_operand.vmem [shape: f32[8,1], index: 2, kind: input, shape index: {}]   ;;  %s578_s3 = inlined_call_operand.vmem [shape: f32[2,8,256], index: 3, kind: output, shape index: {}]  }
   0x1   :  { %s540_s14 = smov 0  }
   0x2 LB: > { %s32_s15 = sadd.s32 1, %s509_s13  ;;  %p453_p0 = scmp.ge.s32.totalorder %s513_s14, 1  ;;  %s513_s14 = sphi %s540_s14, %s13_s14   ;;  %s509_s13 = sphi %s538_s13, %s580_s13   ;;  %s505_s12 = sphi %s536_s12, %s579_s12  }
   0x3   : > { %p34_p1 = scmp.ge.s32.totalorder %s32_s15, 2  ;;  %p180_p2 = scmp.lt.s32.totalorder %s513_s14, 3 }
   0x5   : > { %s582_s15 = smov (%p34_p1, %s32_s15), 0  ;;  %p181_p3 = pnand %p453_p0, %p180_p2 }
   0x6   : > { %p221_p4 = scmp.lt.s32.totalorder (!%p181_p3), %s505_s12, 1 }
   0x7   : > { %184 = sbr.rel (%p181_p3) target bundleno = 224 (0xe0), region = 32 }
   0xc   : > { %v515_v0 = vmov 0   ;;  %v325_v1 = vld [vmem:[%s577_s2] sm:$0xff]  ;;  %s584_s12 = smov (!%p221_p4, %s505_s12), 1  ;;  %vm268_vm0 = vcmask 1041408   ;;  %vm264_vm1 = vcmask 31744  }
   0xd   : > { %307 = vmatprep.mubr.bf16.mxu0 %v515_v0  ;;  %489 = vset.pattern.permute.xlu0 %v515_v0  ;;  %s462_s18 = sshll.u32 %s584_s12, 3  ;;  %v263_v7 = vld [vmem:[%s576_s1] sm:$0xf]  ;;  %s463_s24 = sshll.u32 %s584_s12, 4 }
   0xe   : > { %328 = vperm.xlu0 %489, %v325_v1   ;;  %s232_s21 = scalar_lea.vmem %s575_s0, %s462_s18  ;;  %s246_s27 = scalar_lea.vmem %s578_s3, %s463_s24 }
   0xf   : > { %v255_v2 = vld [vmem:[%s232_s21] sm:$0xff] }
  0x10   : > { %v257_v3 = vcombine.high %v255_v2, %v255_v2  ;;  %v259_v4 = vpack.c.bf16 %v255_v2, %v255_v2 }
  0x12   : > { %v260_v5 = vpack.c.bf16 %v257_v3, %v257_v3  ;;  %v270_v6 = vsel %vm268_vm0, %v259_v4, 0 }
  0x14   : > { %458 = vmatprep.subr.msk.bf16.mxu0 %vm268_vm0, %v260_v5 }
  0x15   : > { %290 = vmatpush1.bf16.msra.mxu0 %v270_v6 }
  0x18   : > { %459 = vmatmul.mubr.msk.bf16.vlgmr.msra.gmra.mxu0 %vm264_vm1, %v263_v7 }
  0x89   : > { %v329_v8 = vpop.permute.xlu0 %328 }
  0xd8   : > { %v309_v9 = vpop.f32.mrf.mxu0 }
  0xd9   : > { %v331_v10 = vadd.f32 %v329_v8, %v309_v9 }
  0xda   : > { %v311_v11 = vpop.f32.mrf.mxu0 }
  0xdb   : > { %v333_v12 = vmax.f32 %v331_v10, 0.0  ;;  %v332_v13 = vadd.f32 %v329_v8, %v311_v11 }
  0xdc   : > { %v313_v14 = vpop.f32.mrf.mxu0 }
  0xdd   : > { %335 = vst [vmem:[%s246_s27] sm:$0xff] %v333_v12  ;;  %v334_v15 = vmax.f32 %v332_v13, 0.0 }
  0xde   : > { %v314_v16 = vpop.f32.mrf.mxu0 }
  0xdf   : > { %336 = vst [vmem:[%s246_s27 + $0x8] sm:$0xff] %v334_v15 }
  0xe0 PF: > { %s13_s14 = sadd.s32 1, %s513_s14   ;;  %s579_s12 = smov %s509_s13 }
  0xe1   : > { %p10_p5 = scmp.ge.s32.totalorder %s13_s14, 4   ;;  %s580_s13 = smov %s582_s15 }
  0xe3   :  { %12 = sbr.rel (!%p10_p5) target bundleno = 2 (0x2), region = 73 }

</bundles_post_ra>
